<compile_context>
chip_gen: v6e
topology: v6e:2x2x1
jax: 0.10.0
libtpu: 0.0.40
codegen_flags: <defaults>
</compile_context>

<pallas_src>
import functools

import jax
import jax.numpy as jnp
from jax import lax
from jax.experimental import pallas as pl
from jax.experimental.pallas import tpu as pltpu


def _pick_tile(dim, unit, max_tile):
    """Largest divisor of `dim` that is <= max_tile and a multiple of `unit`.

    Falls back to the full dimension (block == full array dim is always legal).
    """
    t = min(max_tile, dim)
    t -= t % unit
    while t >= unit:
        if dim % t == 0:
            return t
        t -= unit
    return dim


def _label_smoothing_kernel(x_ref, t_ref, out_ref, acc_ref, *,
                            smoothing, num_classes, block_c):
    """Grid = (row_blocks, class_blocks); class axis is the reduction axis."""
    j = pl.program_id(1)

    # Upcast once per tile; all math / accumulation in f32.
    x = x_ref[...].astype(jnp.float32)          # (TN, TC)
    t = t_ref[...]                              # (TN, 1) int32 labels
    tn, tc = x.shape

    base_w = jnp.float32(smoothing / num_classes)                     # eps / n
    tgt_w = jnp.float32(smoothing / num_classes + (1.0 - smoothing))  # eps/n + (1-eps)

    # Global class index of every element of this tile (lanes axis).
    col = lax.broadcasted_iota(jnp.int32, (tn, tc), 1) + j * block_c
    w = jnp.where(col == t, tgt_w, base_w)      # fused "one-hot": select of two constants
    contrib = x * w                             # (TN, TC) f32, pure VPU

    @pl.when(j == 0)
    def _():
        acc_ref[...] = jnp.zeros_like(acc_ref)

    # Elementwise accumulate; no cross-lane reduce in the inner loop.
    acc_ref[...] += contrib

    @pl.when(j == pl.num_programs(1) - 1)
    def _():
        # Single cross-lane/sublane collapse per row block.
        s = jnp.sum(acc_ref[...])
        out_ref[...] = jnp.zeros(out_ref.shape, jnp.float32) + s


def label_smoothing_loss(x, target, *, smoothing=0.0,
                         block_n=256, block_c=2048,
                         vmem_limit_bytes=48 * 1024 * 1024):
    """x: (N, C) log-probs (f32 or bf16, passed through natively);
    target: (N,) int labels. Returns scalar f32 loss."""
    n_rows, n_cls = x.shape
    tn = _pick_tile(n_rows, 8, block_n)      # sublane-aligned row tile
    tc = _pick_tile(n_cls, 128, block_c)     # lane-aligned class tile
    grid = (n_rows // tn, n_cls // tc)
    t2d = target.reshape(n_rows, 1).astype(jnp.int32)

    # HBM-bound reduction: bytes dominate; ~3 VPU ops / element, no transcendentals.
    cost = pl.CostEstimate(
        flops=3 * n_rows * n_cls,
        transcendentals=0,
        bytes_accessed=(n_rows * n_cls * x.dtype.itemsize
                        + n_rows * 4
                        + grid[0] * 8 * 128 * 4),
    )

    partials = pl.pallas_call(
        functools.partial(_label_smoothing_kernel,
                          smoothing=float(smoothing),
                          num_classes=n_cls,
                          block_c=tc),
        out_shape=jax.ShapeDtypeStruct((grid[0], 8, 128), jnp.float32),
        grid_spec=pltpu.PrefetchScalarGridSpec(
            num_scalar_prefetch=0,
            grid=grid,
            in_specs=[
                pl.BlockSpec((tn, tc), lambda i, j: (i, j)),   # x tile (native dtype)
                pl.BlockSpec((tn, 1), lambda i, j: (i, 0)),    # target column
            ],
            # One (8,128) partial slab per row block; same block across the
            # reduction axis -> resident accumulator output.
            out_specs=pl.BlockSpec((1, 8, 128), lambda i, j: (i, 0, 0)),
            scratch_shapes=[pltpu.VMEM((tn, tc), jnp.float32)],
        ),
        compiler_params=pltpu.CompilerParams(
            dimension_semantics=("parallel", "arbitrary"),
            vmem_limit_bytes=vmem_limit_bytes,
        ),
        cost_estimate=cost,
    )(x, t2d)

    # Tiny finalize in JAX: sum row-block partials, apply -1/N.
    weighted_total = jnp.sum(partials[:, 0, 0])
    return -weighted_total / jnp.float32(n_rows)


def _reference(x, target, smoothing):
    n_cls = x.shape[-1]
    loss = jnp.mean(-jnp.sum(x, axis=-1))
    nll = jnp.mean(-x[jnp.arange(x.shape[0]), target])
    return smoothing * (loss / n_cls) + (1.0 - smoothing) * nll


if __name__ == "__main__":
    key = jax.random.PRNGKey(0)
    k_logits, k_tgt = jax.random.split(key)

    N, C = 64, 512          # batch=64, vocab=512
    smoothing = 0.1

    logits = jax.random.normal(k_logits, (N, C), dtype=jnp.float32)
    x_f32 = jax.nn.log_softmax(logits, axis=-1)          # nll_loss expects log-probs
    x_bf16 = x_f32.astype(jnp.bfloat16)
    target = jax.random.randint(k_tgt, (N,), 0, C, dtype=jnp.int32)

    # Small blocks so the demo exercises a real (2, 2) grid.
    kwargs = dict(smoothing=smoothing, block_n=32, block_c=256)

    # bf16 on the wire, f32 accumulation in-kernel.
    out_bf16 = jax.block_until_ready(label_smoothing_loss(x_bf16, target, **kwargs))
    ref_bf16 = _reference(x_bf16.astype(jnp.float32), target, smoothing)
    assert jnp.allclose(out_bf16, ref_bf16, atol=1e-4, rtol=1e-4), (out_bf16, ref_bf16)

    # f32 path.
    out_f32 = jax.block_until_ready(label_smoothing_loss(x_f32, target, **kwargs))
    ref_f32 = _reference(x_f32, target, smoothing)
    assert jnp.allclose(out_f32, ref_f32, atol=1e-5, rtol=1e-5), (out_f32, ref_f32)

    print("KERNEL_OK")
</pallas_src>

<mosaic_0001>
module attributes {stable_mosaic.version = 11 : i64} {
  func.func @_label_smoothing_kernel(%arg0: i32, %arg1: i32, %arg2: memref<32x256xbf16, #tpu.memory_space<vmem>>, %arg3: memref<32x1xi32, #tpu.memory_space<vmem>>, %arg4: memref<1x8x128xf32, #tpu.memory_space<vmem>>, %arg5: memref<32x256xf32, #tpu.memory_space<vmem>>) attributes {dimension_semantics = [#tpu.dimension_semantics<parallel>, #tpu.dimension_semantics<arbitrary>], iteration_bounds = array<i64: 2, 2>, scalar_prefetch = 0 : i64, scratch_operands = 1 : i64, tpu.core_type = #tpu.core_type<tc>, window_params = [{transform_indices = @transform_0, window_bounds = array<i64: 32, 256>}, {transform_indices = @transform_1, window_bounds = array<i64: 32, 1>}, {transform_indices = @transform_2, window_bounds = array<i64: 1, 8, 128>}]} {
    %c0 = arith.constant 0 : index
    %c0_0 = arith.constant 0 : index
    %0 = vector.load %arg2[%c0, %c0_0] : memref<32x256xbf16, #tpu.memory_space<vmem>>, vector<32x256xbf16>
    %1 = arith.extf %0 : vector<32x256xbf16> to vector<32x256xf32>
    %c0_1 = arith.constant 0 : index
    %c0_2 = arith.constant 0 : index
    %2 = vector.load %arg3[%c0_1, %c0_2] : memref<32x1xi32, #tpu.memory_space<vmem>>, vector<32x1xi32>
    %3 = tpu.iota {dimensions = array<i32: 1>} : vector<32x256xi32>
    %c256_i32 = arith.constant 256 : i32
    %4 = arith.muli %arg1, %c256_i32 : i32
    %5 = vector.broadcast %4 : i32 to vector<32x256xi32>
    %6 = arith.addi %3, %5 : vector<32x256xi32>
    %7 = vector.broadcast %2 : vector<32x1xi32> to vector<32x256xi32>
    %8 = arith.cmpi eq, %6, %7 : vector<32x256xi32>
    %cst = arith.constant 0.9001953 : f32
    %cst_3 = arith.constant 1.95312503E-4 : f32
    %9 = vector.broadcast %cst : f32 to vector<32x256xf32>
    %10 = vector.broadcast %cst_3 : f32 to vector<32x256xf32>
    %11 = arith.select %8, %9, %10 : vector<32x256xi1>, vector<32x256xf32>
    %12 = arith.mulf %1, %11 : vector<32x256xf32>
    %c0_i32 = arith.constant 0 : i32
    %13 = arith.cmpi eq, %arg1, %c0_i32 : i32
    %14 = arith.extui %13 : i1 to i32
    %c0_i32_4 = arith.constant 0 : i32
    %15 = arith.cmpi ne, %14, %c0_i32_4 : i32
    scf.if %15 {
      %cst_10 = arith.constant 0.000000e+00 : f32
      %22 = vector.broadcast %cst_10 : f32 to vector<32x256xf32>
      %c0_11 = arith.constant 0 : index
      %c0_12 = arith.constant 0 : index
      %23 = vector.load %arg5[%c0_11, %c0_12] : memref<32x256xf32, #tpu.memory_space<vmem>>, vector<32x256xf32>
      tpu.vector_store %arg5[%c0_11, %c0_12], %22 {strides = array<i32>} : memref<32x256xf32, #tpu.memory_space<vmem>>, vector<32x256xf32>,
    } else {
    }
    %c0_5 = arith.constant 0 : index
    %c0_6 = arith.constant 0 : index
    %16 = vector.load %arg5[%c0_5, %c0_6] : memref<32x256xf32, #tpu.memory_space<vmem>>, vector<32x256xf32>
    %17 = arith.addf %16, %12 : vector<32x256xf32>
    %c0_7 = arith.constant 0 : index
    %c0_8 = arith.constant 0 : index
    %18 = vector.load %arg5[%c0_7, %c0_8] : memref<32x256xf32, #tpu.memory_space<vmem>>, vector<32x256xf32>
    tpu.vector_store %arg5[%c0_7, %c0_8], %17 {strides = array<i32>} : memref<32x256xf32, #tpu.memory_space<vmem>>, vector<32x256xf32>,
    %c1_i32 = arith.constant 1 : i32
    %19 = arith.cmpi eq, %arg1, %c1_i32 : i32
    %20 = arith.extui %19 : i1 to i32
    %c0_i32_9 = arith.constant 0 : i32
    %21 = arith.cmpi ne, %20, %c0_i32_9 : i32
    scf.if %21 {
      %c0_10 = arith.constant 0 : index
      %c0_11 = arith.constant 0 : index
      %22 = vector.load %arg5[%c0_10, %c0_11] : memref<32x256xf32, #tpu.memory_space<vmem>>, vector<32x256xf32>
      %23 = vector.shape_cast %22 : vector<32x256xf32> to vector<1x32x256xf32>
      %cst_12 = arith.constant dense<0.000000e+00> : vector<1xf32>
      %24 = vector.multi_reduction <add>, %23, %cst_12 [1, 2] : vector<1x32x256xf32> to vector<1xf32>
      %25 = vector.shape_cast %24 : vector<1xf32> to vector<1x1x1xf32>
      %26 = vector.extract %25[0, 0, 0] : f32 from vector<1x1x1xf32>
      %cst_13 = arith.constant 0.000000e+00 : f32
      %27 = vector.broadcast %cst_13 : f32 to vector<1x8x128xf32>
      %28 = vector.broadcast %26 : f32 to vector<1x8x128xf32>
      %29 = arith.addf %27, %28 : vector<1x8x128xf32>
      %c0_14 = arith.constant 0 : index
      %c0_15 = arith.constant 0 : index
      %c0_16 = arith.constant 0 : index
      %30 = vector.load %arg4[%c0_14, %c0_15, %c0_16] : memref<1x8x128xf32, #tpu.memory_space<vmem>>, vector<1x8x128xf32>
      tpu.vector_store %arg4[%c0_14, %c0_15, %c0_16], %29 {strides = array<i32>} : memref<1x8x128xf32, #tpu.memory_space<vmem>>, vector<1x8x128xf32>,
    } else {
    }
    return
  }
  func.func @transform_0(%arg0: i32, %arg1: i32) -> (i32, i32) {
    %c0_i32 = arith.constant 0 : i32
    return %arg0, %arg1 : i32, i32
  }
  func.func @transform_1(%arg0: i32, %arg1: i32) -> (i32, i32) {
    %c0_i32 = arith.constant 0 : i32
    %c0_i32_0 = arith.constant 0 : i32
    return %arg0, %c0_i32 : i32, i32
  }
  func.func @transform_2(%arg0: i32, %arg1: i32) -> (i32, i32, i32) {
    %c0_i32 = arith.constant 0 : i32
    %c0_i32_0 = arith.constant 0 : i32
    %c0_i32_1 = arith.constant 0 : i32
    return %arg0, %c0_i32, %c0_i32_0 : i32, i32, i32
  }
}

</mosaic_0001>

<bundles_post_ra>
// kernel: tpu_custom_call.1
= control target key start
LH: loop header
LB: loop body
LE: loop exit
PB: predicated region body
PF: predicated region fallthrough
CT: control target
= control target key end

     0   :  { %7 = vsyncpa [#allocation4], 0  ;;  %s948_s0 = inlined_call_operand.hbm [shape: bf16[64,512], index: 0, kind: input, shape index: {}]   ;;  %s949_s1 = inlined_call_operand.vmem [shape: s32[64,1], index: 1, kind: input, shape index: {}]   ;;  %s950_s2 = inlined_call_operand.hbm [shape: f32[2,8,128], index: 2, kind: output, shape index: {}]  }
   0x1   :  { %9 = vsyncpa [#allocation4 + $0x1], 0 }
   0x2   :  { %10 = vsyncpa [#allocation5], 0 }
   0x3   :  { %12 = vsyncpa [#allocation5 + $0x1], 0  ;;  %s746_s9 = smov 0   ;;  %s748_s10 = smov 0  }
   0x4   :  { %s750_s11 = smov 0   ;;  %s752_s12 = smov 0  }
   0x5   :  { %s754_s13 = smov 0   ;;  %s756_s14 = smov 0  }
   0x6   :  { %s758_s15 = smov 0   ;;  %s760_s16 = smov 0  }
   0x7   :  { %s762_s17 = smov 0   ;;  %s764_s18 = smov 0  }
   0x8   :  { %s766_s19 = smov 0  }
   0x9 LB: > { %954 = sst [smem:[#allocation9_spill]] %s717_s18  ;;  %s439_s20 = sadd.s32 4294967295, %s721_s19   ;;  %s721_s19 = sphi %s766_s19, %s18_s19   ;;  %s717_s18 = sphi %s764_s18, %s966_s18   ;;  %s713_s17 = sphi %s762_s17, %s974_s17   ;;  %s709_s16 = sphi %s760_s16, %s964_s16   ;;  %s705_s15 = sphi %s758_s15, %s973_s15   ;;  %s701_s14 = sphi %s756_s14, %s972_s14   ;;  %s697_s13 = sphi %s754_s13, %s971_s13   ;;  %s693_s12 = sphi %s752_s12, %s970_s12   ;;  %s689_s11 = sphi %s750_s11, %s969_s11   ;;  %s685_s10 = sphi %s748_s10, %s968_s10   ;;  %s681_s9 = sphi %s746_s9, %s967_s9  }
   0xa   : > { %s440_s21 = sadd.s32 4294967294, %s721_s19   ;;  %s27_s22 = sadd.s32 1, %s713_s17 }
   0xb   : > { %s30_s23 = sadd.s32 1, %s717_s18  ;;  %p28_p0 = scmp.ge.s32.totalorder %s27_s22, 2 }
   0xc   : > { %s39_s24 = sadd.s32 1, %s701_s14  ;;  %p46_p1 = scmp.ne.s32.totalorder %s701_s14, %s697_s13 }
   0xd   : > { %p47_p2 = scmp.eq.s32.totalorder %s721_s19, 0  ;;  %s976_s22 = smov (%p28_p0, %s27_s22), 0 }
   0xe   : > { %955 = sst [smem:[#allocation10_spill]] %s976_s22  ;;  %s978_s23 = smov (!%p28_p0, %s30_s23), %s717_s18 }
   0xf   : > { %s35_s25 = ssub.s32 %s713_s17, %s976_s22  ;;  %p812_p3 = por %p47_p2, %p46_p1 }
  0x10   : > { %p32_p4 = scmp.ge.s32.totalorder %s978_s23, 2  ;;  %p52_p5 = scmp.ne.s32.totalorder %s697_s13, %s693_s12 }
  0x11   : > { %p53_p6 = scmp.eq.s32.totalorder %s439_s20, 0  ;;  %s91_s27 = sadd.s32 1, %s689_s11 }
  0x12   : > { %s980_s23 = smov (%p32_p4, %s978_s23), 0  ;;  %p101_p8 = scmp.ne.s32.totalorder %s689_s11, %s685_s10 }
  0x13   : > { %957 = sst [smem:[#allocation11_spill]] %s980_s23  ;;  %p820_p7 = por %p53_p6, %p52_p5 }
  0x14   : > { %s34_s29 = ssub.s32 %s717_s18, %s980_s23  ;;  %p102_p9 = scmp.eq.s32.totalorder %s439_s20, 3 }
  0x15   : > { %s36_s30 = sor.u32 %s35_s25, %s34_s29  ;;  %p89_p10 = scmp.eq.s32.totalorder %s34_s29, 0 }
  0x16   : > { %p37_p11 = scmp.eq.s32.totalorder %s36_s30, 0  ;;  %p828_p12 = por %p102_p9, %p101_p8 }
  0x17   : > { %s833_s4 = scalar_select %p89_p10, %s689_s11, %s91_s27  }
  0x18   : > { %s836_s5 = scalar_select %p37_p11, %s701_s14, %s39_s24  }
  0x19   : > { %p107_p13 = scmp.ne.s32.totalorder %s685_s10, %s681_s9  ;;  %p108_p0 = scmp.eq.s32.totalorder %s440_s21, 3 }
  0x1a   : > { %960 = sst [smem:[#allocation12_spill]] %s836_s5  ;;  %p475_p1 = scmp.lt.s32.totalorder %s721_s19, 4 }
  0x1b   : > { %p841_p2 = por %p108_p0, %p107_p13  ;;  %s128_s7 = sand.u32 1, %s701_s14  }
  0x1c   : > { %s443_s8 = sshll.u32 %s128_s7, 5  ;;  %s445_s12 = sshll.u32 %s713_s17, 1 }
  0x1d   : > { %s460_s20 = sshll.u32 %s717_s18, 4  ;;  %s132_s25 = scalar_lea.vmem [#allocation3], %s443_s8 }
  0x1e   : > { %s142_s29 = sshll.u32 %s132_s25, 4  ;;  %s139_s30 = sadd.s32 %s460_s20, %s445_s12  ;;  %s143_s29 = int_to_ptr.vmem [resolvable:$true] %s142_s29 }
  0x1f   : > { %s447_s27 = sshll.u32 %s139_s30, 6  ;;  %p850_p4 = pnand %p475_p1, %p812_p3 }
  0x20   : > { %s141_s22 = scalar_lea.hbm %s948_s0, %s447_s27  ;;  %p448_p5 = scmp.ge.s32.totalorder %s721_s19, 1 }
  0x21   : > { %s129_s5 = scalar_lea.sflag [#allocation4], %s128_s7  ;;  %p575_p6 = pneg %p850_p4 }
  0x22   : > { %s586_s18 = scalar_lea.vmem %s143_s29, 512  ;;  %s723_s8 = smov [#allocation3]  }
  0x23   : > { %p587_p8 = scmp.ne.s32.totalorder %s143_s29, %s586_s18  ;;  %s591_s12 = sshll.u32 %s723_s8, 4  ;;  %s592_s12 = int_to_ptr.vmem [resolvable:$false] %s591_s12 }
  0x24   : > { %s593_s26 = scalar_lea.vmem %s592_s12, 1024  ;;  %p594_p3 = scmp.lt.s32.totalorder %s143_s29, %s592_s12 }
  0x25   : > { %p589_p9 = pnand %p587_p8, %p575_p6  ;;  %p595_p11 = scmp.lt.s32.totalorder %s593_s26, %s586_s18 }
  0x27   : > { %p590_p10 = pneg %p589_p9  ;;  %p596_p13 = por %p595_p11, %p594_p3 }
  0x29   : > { %p597_p0 = pnand %p596_p13, %p590_p10 }
  0x2b   : > { %600 = shalt.err (!%p597_p0)
}
  0x2c   : > { %s724_s23 = smov 256   ;;  %s725_s7 = smov 128  }
  0x2d   : > { %s726_s20 = smov 8   ;;  %p159_p1 = scmp.lt.s32.totalorder %s721_s19, 5 }
  0x2e   : > { %470 = dma.hbm_to_vmem [thread:$0]  (!%p850_p4), %s141_s22, 512, %s143_s29, %s129_s5, %s724_s23, %s725_s7, %s726_s20  }
  0x2f   : > { %p160_p6 = pnand %p448_p5, %p159_p1 }
  0x30   : > { %s165_s25 = sand.u32 (!%p160_p6), 1, %s697_s13  }
  0x31   : > { %163 = sbr.rel (%p160_p6) target bundleno = 452 (0x1c4), region = 28  ;;  %s449_s30 = sshll.u32 (!%p160_p6), %s165_s25, 5 }
  0x32   : > { %s166_s18 = scalar_lea.sflag (!%p160_p6), [#allocation4], %s165_s25  ;;  %s866_s27 = scalar_lea.vmem (!%p160_p6), [#allocation3], %s449_s30 }
  0x36   : > { %672 = dma.done.wait (%p820_p7), %s166_s18, 512  }
  0x37   : > { %674 = vsyncadd (%p820_p7), %s166_s18, 4294966784  ;;  %s451_s22 = sshll.u32 %s709_s16, 2  ;;  %v727_v0 = vmov 0   ;;  %s192_s28 = sand.u32 1, %s685_s10   ;;  %v219_v5 = vlaneseq  ;;  %v205_v9 = vld [vmem:[%s866_s27 + $0x10] sm:$0xff]  ;;  %v203_v10 = vld [vmem:[%s866_s27] sm:$0xff] }
  0x38   : > { %572 = vset.pattern.permute.xlu1 %v727_v0  ;;  %571 = vset.pattern.permute.xlu0 %v727_v0  ;;  %p198_p4 = scmp.lt.s32.totalorder %s451_s22, 7  ;;  %s879_s8 = sshll.u32 %s192_s28, 3  ;;  %v206_v13 = vld [vmem:[%s866_s27 + $0x18] sm:$0xff]  ;;  %v211_v14 = vunpack.c.l.bf16 %v205_v9  ;;  %v212_v15 = vunpack.c.h.bf16 %v205_v9  ;;  %v207_v16 = vunpack.c.l.bf16 %v203_v10  ;;  %v204_v17 = vld [vmem:[%s866_s27 + $0x8] sm:$0xff]  ;;  %v208_v20 = vunpack.c.h.bf16 %v203_v10 }
  0x39   : > { %v220_v6 = vand.u32 127, %v219_v5  ;;  %s453_s12 = sshll.u32 %s705_s15, 8  ;;  %v213_v21 = vunpack.c.l.bf16 %v206_v13  ;;  %v214_v22 = vunpack.c.h.bf16 %v206_v13  ;;  %v728_v23 = vmov 0.0001953125   ;;  %s194_s26 = scalar_lea.vmem [#allocation6], %s879_s8 }
  0x3a   : > { %s982_s22 = smov (!%p198_p4, %s451_s22), 7  ;;  %v223_v8 = vstv %s453_s12  ;;  %v209_v27 = vunpack.c.l.bf16 %v204_v17  ;;  %v210_v35 = vunpack.c.h.bf16 %v204_v17  ;;  %p454_p7 = scmp.ne.s32.totalorder %s705_s15, 0 }
  0x3b   : > { %s452_s5 = sshll.u32 %s982_s22, 3  ;;  %v221_v7 = vadd.s32 128, %v220_v6  ;;  %v224_v11 = vadd.s32 %v223_v8, %v220_v6 }
  0x3c   : > { %s201_s21 = scalar_lea.vmem %s949_s1, %s452_s5 }
  0x3d   : > { %v217_v1 = vld [vmem:[%s201_s21 + $0x10] sm:$0xff]  ;;  %v215_v2 = vld [vmem:[%s201_s21] sm:$0xff]  ;;  %v218_v3 = vld [vmem:[%s201_s21 + $0x18] sm:$0xff]  ;;  %v225_v12 = vadd.s32 %v223_v8, %v221_v7 }
  0x3e   : > { %233 = vperm.xlu1 %572, %v217_v1   ;;  %227 = vperm.xlu0 %571, %v215_v2   ;;  %v216_v4 = vld [vmem:[%s201_s21 + $0x8] sm:$0xff] }
  0x42   : > { %236 = vperm.xlu1 %572, %v218_v3   ;;  %230 = vperm.xlu0 %571, %v216_v4  }
  0xb9   : > { %v234_v18 = vpop.permute.xlu1 %233  ;;  %v228_v19 = vpop.permute.xlu0 %227 }
  0xba   : > { %vm242_vm0 = vcmp.eq.s32.totalorder %v224_v11, %v234_v18  ;;  %vm243_vm1 = vcmp.eq.s32.totalorder %v225_v12, %v234_v18  ;;  %vm238_vm2 = vcmp.eq.s32.totalorder %v224_v11, %v228_v19  ;;  %vm239_vm3 = vcmp.eq.s32.totalorder %v225_v12, %v228_v19 }
  0xbb   : > { %v250_v24 = vsel %vm242_vm0, 0.9001953, %v728_v23  ;;  %v251_v25 = vsel %vm243_vm1, 0.9001953, %v728_v23  ;;  %v246_v26 = vsel %vm238_vm2, 0.9001953, %v728_v23 }
  0xbc   : > { %v258_v28 = vmul.f32 %v250_v24, %v211_v14  ;;  %v259_v29 = vmul.f32 %v251_v25, %v212_v15  ;;  %v247_v30 = vsel %vm239_vm3, 0.9001953, %v728_v23  ;;  %v254_v31 = vmul.f32 %v246_v26, %v207_v16 }
  0xbd   : > { %v255_v32 = vmul.f32 %v247_v30, %v208_v20  ;;  %v237_v33 = vpop.permute.xlu1 %236  ;;  %v231_v34 = vpop.permute.xlu0 %230  ;;  %265 = sbr.rel (%p454_p7) target bundleno = 199 (0xc7), region = 36 }
  0xbe   : > { %vm244_vm4 = vcmp.eq.s32.totalorder %v224_v11, %v237_v33  ;;  %vm245_vm5 = vcmp.eq.s32.totalorder %v225_v12, %v237_v33  ;;  %vm240_vm6 = vcmp.eq.s32.totalorder %v224_v11, %v231_v34  ;;  %vm241_vm7 = vcmp.eq.s32.totalorder %v225_v12, %v231_v34 }
  0xbf   : > { %v252_v36 = vsel %vm244_vm4, 0.9001953, %v728_v23  ;;  %v253_v37 = vsel %vm245_vm5, 0.9001953, %v728_v23  ;;  %v248_v38 = vsel %vm240_vm6, 0.9001953, %v728_v23 }
  0xc0   : > { %v260_v39 = vmul.f32 %v252_v36, %v213_v21  ;;  %v261_v40 = vmul.f32 %v253_v37, %v214_v22  ;;  %v249_v41 = vsel %vm241_vm7, 0.9001953, %v728_v23  ;;  %v256_v42 = vmul.f32 %v248_v38, %v209_v27 }
  0xc1   : > { %v257_v43 = vmul.f32 %v249_v41, %v210_v35 }
  0xc2   : > { %v729_v44 = vmov 0.0  }
  0xc3   : > { %266 = vst [vmem:[#allocation2 + $0x30] sm:$0xff] %v729_v44  ;;  %267 = vst [vmem:[#allocation2] sm:$0xff] %v729_v44 }
  0xc4   : > { %268 = vst [vmem:[#allocation2 + $0x18] sm:$0xff] %v729_v44  ;;  %269 = vst [vmem:[#allocation2 + $0x10] sm:$0xff] %v729_v44 }
  0xc5   : > { %270 = vst [vmem:[#allocation2 + $0x8] sm:$0xff] %v729_v44  ;;  %271 = vst [vmem:[#allocation2 + $0x20] sm:$0xff] %v729_v44 }
  0xc6   : > { %272 = vst [vmem:[#allocation2 + $0x28] sm:$0xff] %v729_v44  ;;  %273 = vst [vmem:[#allocation2 + $0x38] sm:$0xff] %v729_v44 }
  0xc7 PF: > { %p455_p5 = scmp.ne.s32.totalorder %s705_s15, 1 }
  0xca   : > { %v274_v45 = vld [vmem:[#allocation2 + $0x30] sm:$0xff]  ;;  %v275_v46 = vld [vmem:[#allocation2] sm:$0xff] }
  0xcb   : > { %v276_v47 = vld [vmem:[#allocation2 + $0x18] sm:$0xff]  ;;  %v282_v48 = vadd.f32 %v274_v45, %v254_v31  ;;  %v283_v49 = vadd.f32 %v275_v46, %v255_v32  ;;  %v277_v51 = vld [vmem:[#allocation2 + $0x10] sm:$0xff] }
  0xcc   : > { %v284_v50 = vadd.f32 %v276_v47, %v256_v42  ;;  %v278_v52 = vld [vmem:[#allocation2 + $0x8] sm:$0xff]  ;;  %v279_v53 = vld [vmem:[#allocation2 + $0x20] sm:$0xff]  ;;  %v285_v54 = vadd.f32 %v277_v51, %v257_v43  ;;  %301 = sbr.rel (%p455_p5) target bundleno = 429 (0x1ad), region = 40 }
  0xcd   : > { %v286_v55 = vadd.f32 %v278_v52, %v258_v28  ;;  %v287_v56 = vadd.f32 %v279_v53, %v259_v29  ;;  %v280_v57 = vld [vmem:[#allocation2 + $0x28] sm:$0xff]  ;;  %v281_v58 = vld [vmem:[#allocation2 + $0x38] sm:$0xff]  ;;  %290 = vst [vmem:[#allocation2 + $0x30] sm:$0xff] %v282_v48  ;;  %291 = vst [vmem:[#allocation2] sm:$0xff] %v283_v49 }
  0xce   : > { %292 = vst [vmem:[#allocation2 + $0x18] sm:$0xff] %v284_v50  ;;  %v288_v59 = vadd.f32 %v280_v57, %v260_v39  ;;  %v289_v60 = vadd.f32 %v281_v58, %v261_v40  ;;  %293 = vst [vmem:[#allocation2 + $0x10] sm:$0xff] %v285_v54 }
  0xcf   : > { %294 = vst [vmem:[#allocation2 + $0x8] sm:$0xff] %v286_v55  ;;  %295 = vst [vmem:[#allocation2 + $0x20] sm:$0xff] %v287_v56 }
  0xd0   : > { %296 = vst [vmem:[#allocation2 + $0x28] sm:$0xff] %v288_v59  ;;  %297 = vst [vmem:[#allocation2 + $0x38] sm:$0xff] %v289_v60 }
  0xd4   : > { %v302_v61 = vld [vmem:[#allocation2 + $0x30] sm:$0xff]  ;;  %v303_v62 = vld [vmem:[#allocation2] sm:$0xff] }
  0xd5   : > { %v304_v63 = vld [vmem:[#allocation2 + $0x18] sm:$0xff]  ;;  %v310_v0 = vadd.f32 %v303_v62, %v302_v61  ;;  %v305_v1 = vld [vmem:[#allocation2 + $0x10] sm:$0xff] }
  0xd6   : > { %v306_v3 = vld [vmem:[#allocation2 + $0x8] sm:$0xff]  ;;  %v307_v5 = vld [vmem:[#allocation2 + $0x20] sm:$0xff] }
  0xd7   : > { %v311_v2 = vadd.f32 %v310_v0, %v304_v63  ;;  %v308_v7 = vld [vmem:[#allocation2 + $0x28] sm:$0xff]  ;;  %v309_v9 = vld [vmem:[#allocation2 + $0x38] sm:$0xff] }
  0xd9   : > { %v312_v4 = vadd.f32 %v311_v2, %v305_v1 }
  0xdb   : > { %v313_v6 = vadd.f32 %v312_v4, %v306_v3 }
  0xdd   : > { %v314_v8 = vadd.f32 %v313_v6, %v307_v5 }
  0xdf   : > { %v315_v10 = vadd.f32 %v314_v8, %v308_v7 }
  0xe1   : > { %v316_v11 = vadd.f32 %v315_v10, %v309_v9 }
  0xe3   : > { %317 = vadd.xlane.f32.xlu0 %v316_v11 }
 0x16c   : > { %v318_v12 = vpop.xlane.xlu0 %317 }
 0x16d   : > { %v319_v13 = vrot.slane %v318_v12, 4 }
 0x16f   : > { %v320_v14 = vadd.f32 %v319_v13, %v318_v12 }
 0x171   : > { %v321_v15 = vrot.slane %v320_v14, 2 }
 0x173   : > { %v322_v16 = vadd.f32 %v321_v15, %v320_v14 }
 0x175   : > { %v323_v17 = vrot.slane %v322_v16, 1 }
 0x177   : > { %v324_v18 = vadd.f32 %v323_v17, %v322_v16 }
 0x179   : > { %461 = vpush %v324_v18 }
 0x1aa   : > { %s462_s15 = spop %461 }
 0x1ab   : > { %v326_v19 = vstv %s462_s15 }
 0x1ac   : > { %328 = vst [vmem:[%s194_s26] sm:$0xff] %v326_v19 }
 0x1ad PF: > { %s457_s23 = sshll.u32 %s709_s16, 7  ;;  %s343_s30 = sshll.u32 %s194_s26, 4  ;;  %s344_s30 = int_to_ptr.vmem [resolvable:$true] %s343_s30 }
 0x1ae   : > { %s341_s25 = scalar_lea.hbm %s950_s2, %s457_s23  ;;  %s330_s18 = scalar_lea.sflag [#allocation5], %s192_s28 }
 0x1af   : > { %s601_s27 = scalar_lea.vmem %s344_s30, 128  ;;  %s730_s22 = smov [#allocation6]  }
 0x1b0   : > { %p602_p8 = scmp.ne.s32.totalorder %s344_s30, %s601_s27  ;;  %s605_s5 = sshll.u32 %s730_s22, 4  ;;  %s606_s5 = int_to_ptr.vmem [resolvable:$false] %s605_s5 }
 0x1b1   : > { %s607_s29 = scalar_lea.vmem %s606_s5, 256  ;;  %p608_p3 = scmp.lt.s32.totalorder %s344_s30, %s606_s5 }
 0x1b2   : > { %p603_p9 = pnand %p602_p8, %p828_p12  ;;  %p609_p11 = scmp.lt.s32.totalorder %s607_s29, %s601_s27 }
 0x1b4   : > { %p604_p10 = pneg %p603_p9  ;;  %p610_p13 = por %p609_p11, %p608_p3 }
 0x1b6   : > { %p611_p0 = pnand %p610_p13, %p604_p10 }
 0x1b8   : > { %614 = shalt.err (!%p611_p0)
}
 0x1b9   : > { %s615_s16 = scalar_lea.hbm %s341_s25, 128  ;;  %s619_s28 = scalar_lea.hbm %s950_s2, 256 }
 0x1ba   : > { %p616_p1 = scmp.ne.s32.totalorder %s341_s25, %s615_s16  ;;  %p620_p7 = scmp.lt.s32.totalorder %s341_s25, %s950_s2 }
 0x1bb   : > { %p621_p5 = scmp.lt.s32.totalorder %s619_s28, %s615_s16 }
 0x1bc   : > { %p617_p6 = pnand %p616_p1, %p828_p12 }
 0x1bd   : > { %p622_p8 = por %p621_p5, %p620_p7 }
 0x1be   : > { %p618_p4 = pneg %p617_p6 }
 0x1c0   : > { %p623_p9 = pnand %p622_p8, %p618_p4 }
 0x1c2   : > { %626 = shalt.err (!%p623_p9)
}
 0x1c3   : > { %465 = dma.vmem_to_hbm [thread:$0]  (%p828_p12), %s344_s30, 128, %s341_s25, %s330_s18  }
 0x1c4 PF: > { %p476_p10 = scmp.ge.s32.totalorder %s721_s19, 2  ;;  %s355_s26 = sand.u32 1, %s681_s9  }
 0x1c5   : > { %s356_s15 = scalar_lea.sflag [#allocation5], %s355_s26 }
 0x1c6   : > { %p472_p3 = pnand %p476_p10, %p841_p2 }
 0x1c8   : > { %p473_p11 = pneg %p472_p3 }
 0x1ca   : > { %676 = dma.done.wait (%p473_p11), %s356_s15, 128  }
 0x1cb   : > { %678 = vsyncadd (%p473_p11), %s356_s15, 4294967168  ;;  %s18_s19 = sadd.s32 1, %s721_s19   ;;  %s963_s3 = sld [smem:[#allocation12_spill]] }
 0x1cc   : > { %p15_p13 = scmp.ge.s32.totalorder %s18_s19, 6   ;;  %s964_s16 = sld [smem:[#allocation9_spill]] }
 0x1cd   : > { %s965_s23 = sld [smem:[#allocation10_spill]]  ;;  %s967_s9 = smov %s685_s10 }
 0x1ce   : > { %s966_s18 = sld [smem:[#allocation11_spill]]  ;;  %s968_s10 = smov %s689_s11 }
 0x1cf   : > { %s969_s11 = smov %s833_s4  ;;  %s970_s12 = smov %s697_s13 }
 0x1d0   : > { %s971_s13 = smov %s701_s14  ;;  %s973_s15 = smov %s713_s17 }
 0x1d1   : > { %s972_s14 = smov %s963_s3  ;;  %17 = sbr.rel (!%p15_p13) target bundleno = 9 (0x9), region = 84 }
 0x1d3   : > { %s974_s17 = smov %s965_s23 }
 0x1d6   :  { %361 = vsyncpa [#allocation4], 1 }
 0x1d7   :  { %363 = vsyncpa [#allocation4 + $0x1], 1 }
 0x1d8   :  { %364 = vsyncpa [#allocation5], 1 }
 0x1d9   :  { %366 = vsyncpa [#allocation5 + $0x1], 1 }

</bundles_post_ra>
